<compile_context>
chip_gen: v6e
topology: v6e:2x2x1
jax: 0.10.0
libtpu: 0.0.40
codegen_flags: <defaults>
</compile_context>

<pallas_src>
import functools

import jax
import jax.numpy as jnp
from jax.experimental import pallas as pl
from jax.experimental.pallas import tpu as pltpu


_LANE = 128
# Per-buffer input-tile byte budget. BlockSpec double-buffers each input, so the
# steady-state VMEM footprint is ~2x this plus tiny output/scratch slabs.  6 MiB
# keeps us under v5e's 16 MiB default scoped limit and well inside v7x's 64 MiB
# physical VMEM, while staying large enough to sit near the HBM roofline.
_TILE_BUDGET_BYTES = 6 * 1024 * 1024
# Below this total size the fixed pallas_call launch / DMA-setup overhead
# dominates and a fused XLA reduce is at least as fast.
_MIN_PALLAS_BYTES = 512 * 1024
# Above this size, force >= 2 row chunks so the "parallel" grid axis can shard
# across both TensorCores on v7x (negligible cost on single-TC v5e/v6e).
_MULTICORE_SPLIT_BYTES = 2 * 1024 * 1024


def _round_up(x, m):
    return ((x + m - 1) // m) * m


def _round_down(x, m):
    return (x // m) * m


def _spatial_mean_kernel(x_ref, o_ref, acc_ref, *, inv_n):
    """Partial row-sums over one (tb, tc) tile; scale + store on the last col chunk."""
    k = pl.program_id(1)

    @pl.when(k == 0)
    def _():
        acc_ref[...] = jnp.zeros_like(acc_ref)

    x = x_ref[...]
    if x.dtype != jnp.float32:            # f32 accumulation only for low-precision inputs
        x = x.astype(jnp.float32)
    acc_ref[...] += jnp.sum(x, axis=-1)[None, :]

    @pl.when(k == pl.num_programs(1) - 1)
    def _():
        o_ref[...] = (acc_ref[...] * inv_n).astype(o_ref.dtype)


def _choose_tiles(rows, cols, itemsize):
    """Byte-budget-driven (tb, tc) tiles, both 128-aligned (lane-dense, unmasked stores)."""
    cols_padded = _round_up(cols, _LANE)

    # Reduction (cols) tile: keep the full fused spatial axis in one chunk whenever a
    # 128-row tile still fits the budget; otherwise carve 128-multiple col chunks.
    if _LANE * cols_padded * itemsize <= _TILE_BUDGET_BYTES:
        tc = cols_padded
    else:
        tc = _round_down(_TILE_BUDGET_BYTES // (_LANE * itemsize), _LANE)
        tc = max(_LANE, min(tc, cols_padded))
    cols_padded = _round_up(cols, tc)

    # Row tile from the remaining budget; never pad rows beyond one 128-multiple past `rows`.
    tb = _round_down(_TILE_BUDGET_BYTES // (tc * itemsize), _LANE)
    tb = max(_LANE, min(tb, _round_up(rows, _LANE)))
    rows_padded = _round_up(rows, tb)

    # Megacore split: single row chunk but big enough that step overhead is negligible
    # -> halve the row tile so v7x's second TensorCore gets work.
    if (rows_padded // tb == 1 and tb >= 2 * _LANE
            and rows_padded * cols_padded * itemsize > _MULTICORE_SPLIT_BYTES):
        tb = _round_down(tb // 2, _LANE)
        rows_padded = _round_up(rows, tb)

    return tb, tc, rows_padded, cols_padded


def spatial_mean_pallas(x, *, force_pallas=False):
    """func(u) = u.mean(-1).mean(-1)  (NCHW -> NC) as a Pallas TPU kernel."""
    B, C, H, W = x.shape
    rows, cols = B * C, H * W
    itemsize = jnp.dtype(x.dtype).itemsize

    # Tiny tensors: launch overhead dwarfs the ~KiB of data movement.
    if not force_pallas and rows * cols * itemsize < _MIN_PALLAS_BYTES:
        return jnp.mean(x, axis=(-2, -1))

    tb, tc, rows_padded, cols_padded = _choose_tiles(rows, cols, itemsize)

    # Lane-dense (rows, H*W) view; zero-pad to the tile grid (zeros are sum-neutral,
    # padded rows are sliced away below).
    x2 = x.reshape(rows, cols)
    if rows_padded != rows or cols_padded != cols:
        x2 = jnp.pad(x2, ((0, rows_padded - rows), (0, cols_padded - cols)))

    grid = (rows_padded // tb, cols_padded // tc)

    in_tile_bytes = tb * tc * itemsize
    out_tile_bytes = tb * itemsize
    vmem_limit = 2 * in_tile_bytes + 2 * out_tile_bytes + tb * 4 + (2 << 20)
    vmem_limit = int(max(vmem_limit, 16 << 20))   # never below any generation's default

    kernel = functools.partial(_spatial_mean_kernel, inv_n=float(1.0 / cols))

    out = pl.pallas_call(
        kernel,
        out_shape=jax.ShapeDtypeStruct((1, rows_padded), x.dtype),
        grid_spec=pltpu.PrefetchScalarGridSpec(
            num_scalar_prefetch=0,
            grid=grid,
            in_specs=[pl.BlockSpec((tb, tc), lambda i, k: (i, k))],
            out_specs=pl.BlockSpec((1, tb), lambda i, k: (0, i)),
            scratch_shapes=[pltpu.VMEM((1, tb), jnp.float32)],
        ),
        compiler_params=pltpu.CompilerParams(
            dimension_semantics=("parallel", "arbitrary"),
            vmem_limit_bytes=vmem_limit,
        ),
        cost_estimate=pl.CostEstimate(
            flops=rows_padded * cols_padded,
            transcendentals=0,
            bytes_accessed=rows_padded * cols_padded * itemsize
            + rows_padded * itemsize,
        ),
    )(x2)
    return out[0, :rows].reshape(B, C)


class Expression:
    """JAX counterpart of the PyTorch Expression(nn.Module): forward(x) = func(x)."""

    def __init__(self, func):
        self.func = func

    def __call__(self, x):
        return self.func(x)


if __name__ == "__main__":
    # Expression has no parameters (nothing to initialize).
    key = jax.random.PRNGKey(0)
    x = jax.random.normal(key, (2, 4, 16, 16), dtype=jnp.float32)   # NCHW

    # Pallas-backed pooling func plugged into Expression (force the Pallas path so
    # the kernel itself is exercised even at this MNIST-tiny size).
    expr = Expression(functools.partial(spatial_mean_pallas, force_pallas=True))
    y = jax.block_until_ready(expr(x))

    ref = jnp.mean(jnp.mean(x, axis=-1), axis=-1)
    assert y.shape == (2, 4)
    assert jnp.allclose(y, ref, atol=1e-5, rtol=1e-5)

    # Secondary check: non-128-multiple cols (784 -> padded 896) and larger rows,
    # exercising the padding + byte-budget tiling path.
    x2 = jax.random.normal(jax.random.PRNGKey(1), (16, 32, 28, 28), dtype=jnp.float32)
    y2 = jax.block_until_ready(spatial_mean_pallas(x2, force_pallas=True))
    ref2 = jnp.mean(jnp.mean(x2, axis=-1), axis=-1)
    assert y2.shape == (16, 32)
    assert jnp.allclose(y2, ref2, atol=1e-5, rtol=1e-5)

    print("KERNEL_OK")
</pallas_src>

<mosaic_0001>
module attributes {stable_mosaic.version = 11 : i64} {
  func.func @_spatial_mean_kernel(%arg0: i32, %arg1: i32, %arg2: memref<128x256xf32, #tpu.memory_space<vmem>>, %arg3: memref<1x128xf32, #tpu.memory_space<vmem>>, %arg4: memref<1x128xf32, #tpu.memory_space<vmem>>) attributes {dimension_semantics = [#tpu.dimension_semantics<parallel>, #tpu.dimension_semantics<arbitrary>], iteration_bounds = array<i64: 1, 1>, scalar_prefetch = 0 : i64, scratch_operands = 1 : i64, tpu.core_type = #tpu.core_type<tc>, window_params = [{transform_indices = @transform_0, window_bounds = array<i64: 128, 256>}, {transform_indices = @transform_1, window_bounds = array<i64: 1, 128>}]} {
    %c0_i32 = arith.constant 0 : i32
    %0 = arith.cmpi eq, %arg1, %c0_i32 : i32
    %1 = arith.extui %0 : i1 to i32
    %c0_i32_0 = arith.constant 0 : i32
    %2 = arith.cmpi ne, %1, %c0_i32_0 : i32
    scf.if %2 {
      %cst_8 = arith.constant 0.000000e+00 : f32
      %12 = vector.broadcast %cst_8 : f32 to vector<1x128xf32>
      %c0_9 = arith.constant 0 : index
      %c0_10 = arith.constant 0 : index
      %13 = vector.load %arg4[%c0_9, %c0_10] : memref<1x128xf32, #tpu.memory_space<vmem>>, vector<1x128xf32>
      tpu.vector_store %arg4[%c0_9, %c0_10], %12 {strides = array<i32>} : memref<1x128xf32, #tpu.memory_space<vmem>>, vector<1x128xf32>,
    } else {
    }
    %c0 = arith.constant 0 : index
    %c0_1 = arith.constant 0 : index
    %3 = vector.load %arg2[%c0, %c0_1] : memref<128x256xf32, #tpu.memory_space<vmem>>, vector<128x256xf32>
    %c0_2 = arith.constant 0 : index
    %c0_3 = arith.constant 0 : index
    %4 = vector.load %arg4[%c0_2, %c0_3] : memref<1x128xf32, #tpu.memory_space<vmem>>, vector<1x128xf32>
    %cst = arith.constant dense<0.000000e+00> : vector<128xf32>
    %5 = vector.multi_reduction <add>, %3, %cst [1] : vector<128x256xf32> to vector<128xf32>
    %6 = vector.shape_cast %5 : vector<128xf32> to vector<1x128xf32>
    %7 = arith.addf %4, %6 : vector<1x128xf32>
    %c0_4 = arith.constant 0 : index
    %c0_5 = arith.constant 0 : index
    %8 = vector.load %arg4[%c0_4, %c0_5] : memref<1x128xf32, #tpu.memory_space<vmem>>, vector<1x128xf32>
    tpu.vector_store %arg4[%c0_4, %c0_5], %7 {strides = array<i32>} : memref<1x128xf32, #tpu.memory_space<vmem>>, vector<1x128xf32>,
    %c0_i32_6 = arith.constant 0 : i32
    %9 = arith.cmpi eq, %arg1, %c0_i32_6 : i32
    %10 = arith.extui %9 : i1 to i32
    %c0_i32_7 = arith.constant 0 : i32
    %11 = arith.cmpi ne, %10, %c0_i32_7 : i32
    scf.if %11 {
      %c0_8 = arith.constant 0 : index
      %c0_9 = arith.constant 0 : index
      %12 = vector.load %arg4[%c0_8, %c0_9] : memref<1x128xf32, #tpu.memory_space<vmem>>, vector<1x128xf32>
      %cst_10 = arith.constant 3.906250e-03 : f32
      %13 = vector.broadcast %cst_10 : f32 to vector<1x128xf32>
      %14 = arith.mulf %12, %13 : vector<1x128xf32>
      %c0_11 = arith.constant 0 : index
      %c0_12 = arith.constant 0 : index
      %15 = vector.load %arg3[%c0_11, %c0_12] : memref<1x128xf32, #tpu.memory_space<vmem>>, vector<1x128xf32>
      tpu.vector_store %arg3[%c0_11, %c0_12], %14 {strides = array<i32>} : memref<1x128xf32, #tpu.memory_space<vmem>>, vector<1x128xf32>,
    } else {
    }
    return
  }
  func.func @transform_0(%arg0: i32, %arg1: i32) -> (i32, i32) {
    %c0_i32 = arith.constant 0 : i32
    return %arg0, %arg1 : i32, i32
  }
  func.func @transform_1(%arg0: i32, %arg1: i32) -> (i32, i32) {
    %c0_i32 = arith.constant 0 : i32
    %c0_i32_0 = arith.constant 0 : i32
    return %c0_i32, %arg0 : i32, i32
  }
}

</mosaic_0001>

<bundles_post_ra>
// kernel: tpu_custom_call.1
= control target key start
LH: loop header
LB: loop body
LE: loop exit
PB: predicated region body
PF: predicated region fallthrough
CT: control target
= control target key end

     0   :  { %6 = vsyncpa [#allocation4], 0  ;;  %s2015_s0 = inlined_call_operand.hbm [shape: f32[128,256], index: 0, kind: input, shape index: {}]   ;;  %s2016_s1 = inlined_call_operand.hbm [shape: f32[1,128], index: 1, kind: output, shape index: {}]  }
   0x1   :  { %7 = vsyncpa [#allocation5], 0  ;;  %s1671_s6 = smov [#allocation3]  }
   0x2   :  { %s13_s7 = sshll.u32 %s1671_s6, 4  ;;  %s14_s7 = int_to_ptr.vmem [resolvable:$true] %s13_s7 }
   0x3   :  { %s1635_s8 = scalar_lea.vmem %s14_s7, 4096  ;;  %p1640_p1 = scmp.lt.s32.totalorder %s14_s7, %s14_s7 }
   0x4   :  { %p1636_p0 = scmp.ne.s32.totalorder %s14_s7, %s1635_s8  ;;  %p1641_p2 = scmp.lt.s32.totalorder %s1635_s8, %s1635_s8 }
   0x6   :  { %p1642_p3 = por %p1641_p2, %p1640_p1 }
   0x8   :  { %p1643_p4 = pnand %p1642_p3, %p1636_p0 }
   0xa   :  { %1646 = shalt.err (!%p1643_p4)
}
   0xb   :  { %s1672_s9 = smov 256   ;;  %s1673_s10 = smov 16  }
   0xc   :  { %19 = dma.hbm_to_vmem [thread:$0]  %s2015_s0, 4096, %s14_s7, [#allocation4], %s1672_s9, %s1672_s9, %s1673_s10  }
   0xd   :  { %1667 = dma.done.wait [#allocation4], 4096  }
   0xe   :  { %1668 = vsyncadd [#allocation4], 4294963200  ;;  %v28_v0 = vld [vmem:[#allocation3] sm:$0xff]  ;;  %v29_v1 = vld [vmem:[#allocation3 + $0x8] sm:$0xff]  ;;  %v1674_v40 = vmov 0   ;;  %v125_v49 = vlaneseq  ;;  %vm1480_vm0 = vcmask 130112  }
   0xf   :  { %v32_v2 = vld [vmem:[#allocation3 + $0x20] sm:$0xff]  ;;  %v61_v3 = vadd.f32 %v29_v1, %v28_v0  ;;  %v33_v4 = vld [vmem:[#allocation3 + $0x28] sm:$0xff]  ;;  %v30_v5 = vld [vmem:[#allocation3 + $0x10] sm:$0xff]  ;;  %1625 = vset.pattern.permute.xlu0 %v1674_v40  ;;  %1626 = vset.pattern.permute.xlu1 %v1674_v40  ;;  %v1675_v50 = vmov 1966171168   ;;  %vm1487_vm1 = vcmask 195712  }
  0x10   :  { %v31_v6 = vld [vmem:[#allocation3 + $0x18] sm:$0xff]  ;;  %v67_v7 = vadd.f32 %v33_v4, %v32_v2  ;;  %v34_v8 = vld [vmem:[#allocation3 + $0x30] sm:$0xff]  ;;  %v36_v12 = vld [vmem:[#allocation3 + $0x40] sm:$0xff]  ;;  %v642_v51 = vunpack.c.l.s4 %v1675_v50  ;;  %v1692_v52 = vshrl.u32 %v125_v49, 7  ;;  %vm1494_vm2 = vcmask 261312   ;;  %s1677_s0 = smov [#allocation6]  }
  0x11   :  { %v35_v9 = vld [vmem:[#allocation3 + $0x38] sm:$0xff]  ;;  %62 = vadd.xlane.f32.xlu0 %v61_v3  ;;  %v64_v10 = vadd.f32 %v31_v6, %v30_v5  ;;  %v37_v13 = vld [vmem:[#allocation3 + $0x48] sm:$0xff]  ;;  %v38_v14 = vld [vmem:[#allocation3 + $0x50] sm:$0xff]  ;;  %vm1501_vm3 = vcmask 326912   ;;  %vm1508_vm4 = vcmask 392512   ;;  %vm1515_vm5 = vcmask 458112  }
  0x12   :  { %68 = vadd.xlane.f32.xlu1 %v67_v7  ;;  %v70_v11 = vadd.f32 %v35_v9, %v34_v8  ;;  %v39_v15 = vld [vmem:[#allocation3 + $0x58] sm:$0xff]  ;;  %v73_v16 = vadd.f32 %v37_v13, %v36_v12  ;;  %v40_v18 = vld [vmem:[#allocation3 + $0x60] sm:$0xff]  ;;  %v41_v19 = vld [vmem:[#allocation3 + $0x68] sm:$0xff]  ;;  %v643_v53 = vunpack.c.0.s8 %v642_v51  ;;  %v1695_v54 = vsub.s32 0, %v1692_v52  ;;  %s1609_s13 = sshll.u32 %s1677_s0, 4  ;;  %s1610_s13 = int_to_ptr.vmem [resolvable:$true] %s1609_s13 }
  0x13   :  { %v76_v17 = vadd.f32 %v39_v15, %v38_v14  ;;  %v42_v20 = vld [vmem:[#allocation3 + $0x70] sm:$0xff]  ;;  %v43_v21 = vld [vmem:[#allocation3 + $0x78] sm:$0xff]  ;;  %v79_v22 = vadd.f32 %v41_v19, %v40_v18  ;;  %v44_v24 = vld [vmem:[#allocation3 + $0x80] sm:$0xff]  ;;  %v1698_v55 = vsub.s32 1, %v1692_v52  ;;  %v1701_v56 = vsub.s32 2, %v1692_v52  ;;  %s1647_s14 = scalar_lea.vmem %s1610_s13, 16  ;;  %p1652_p6 = scmp.lt.s32.totalorder %s1610_s13, %s1610_s13 }
  0x14   :  { %v82_v23 = vadd.f32 %v43_v21, %v42_v20  ;;  %v45_v25 = vld [vmem:[#allocation3 + $0x88] sm:$0xff]  ;;  %v46_v26 = vld [vmem:[#allocation3 + $0x90] sm:$0xff]  ;;  %v47_v27 = vld [vmem:[#allocation3 + $0x98] sm:$0xff]  ;;  %v1704_v57 = vsub.s32 3, %v1692_v52  ;;  %v1707_v58 = vsub.s32 4, %v1692_v52  ;;  %v1710_v59 = vsub.s32 5, %v1692_v52  ;;  %p1648_p5 = scmp.ne.s32.totalorder %s1610_s13, %s1647_s14 }
  0x15   :  { %65 = vadd.xlane.f32.xlu0 %v64_v10  ;;  %v85_v28 = vadd.f32 %v45_v25, %v44_v24  ;;  %v88_v29 = vadd.f32 %v47_v27, %v46_v26  ;;  %v48_v30 = vld [vmem:[#allocation3 + $0xa0] sm:$0xff]  ;;  %v49_v31 = vld [vmem:[#allocation3 + $0xa8] sm:$0xff]  ;;  %v50_v32 = vld [vmem:[#allocation3 + $0xb0] sm:$0xff]  ;;  %v1713_v60 = vsub.s32 6, %v1692_v52  ;;  %v1716_v61 = vsub.s32 7, %v1692_v52  ;;  %s1651_s15 = scalar_lea.vmem %s1610_s13, 32 }
  0x16   :  { %71 = vadd.xlane.f32.xlu1 %v70_v11  ;;  %v51_v33 = vld [vmem:[#allocation3 + $0xb8] sm:$0xff]  ;;  %v91_v34 = vadd.f32 %v49_v31, %v48_v30  ;;  %v52_v36 = vld [vmem:[#allocation3 + $0xc0] sm:$0xff]  ;;  %v53_v37 = vld [vmem:[#allocation3 + $0xc8] sm:$0xff]  ;;  %v1719_v63 = vsub.s32 %v643_v53, %v1692_v52  ;;  %vm1522_vm6 = vcmask 523712   ;;  %vm1529_vm7 = vcmask 589312   ;;  %p1653_p7 = scmp.lt.s32.totalorder %s1651_s15, %s1647_s14 }
  0x17   :  { %v94_v35 = vadd.f32 %v51_v33, %v50_v32  ;;  %v54_v38 = vld [vmem:[#allocation3 + $0xd0] sm:$0xff]  ;;  %v55_v39 = vld [vmem:[#allocation3 + $0xd8] sm:$0xff]  ;;  %v97_v41 = vadd.f32 %v53_v37, %v52_v36  ;;  %v56_v43 = vld [vmem:[#allocation3 + $0xe0] sm:$0xff]  ;;  %vm1536_vm8 = vcmask 654912   ;;  %vm1543_vm9 = vcmask 720512  }
  0x18   :  { %v100_v42 = vadd.f32 %v55_v39, %v54_v38  ;;  %v57_v44 = vld [vmem:[#allocation3 + $0xe8] sm:$0xff]  ;;  %v58_v45 = vld [vmem:[#allocation3 + $0xf0] sm:$0xff]  ;;  %v59_v46 = vld [vmem:[#allocation3 + $0xf8] sm:$0xff]  ;;  %vm1550_vm10 = vcmask 786112   ;;  %vm1557_vm11 = vcmask 851712   ;;  %vm1564_vm12 = vcmask 917312   ;;  %p1654_p8 = por %p1653_p7, %p1652_p6 }
  0x19   :  { %74 = vadd.xlane.f32.xlu0 %v73_v16  ;;  %v103_v47 = vadd.f32 %v57_v44, %v56_v43  ;;  %v106_v48 = vadd.f32 %v59_v46, %v58_v45  ;;  %vm1571_vm13 = vcmask 982912   ;;  %vm1578_vm14 = vcmask 1048512  }
  0x1a   :  { %77 = vadd.xlane.f32.xlu1 %v76_v17  ;;  %p1655_p9 = pnand %p1654_p8, %p1648_p5 }
  0x1d   :  { %80 = vadd.xlane.f32.xlu0 %v79_v22 }
  0x1e   :  { %83 = vadd.xlane.f32.xlu1 %v82_v23 }
  0x21   :  { %86 = vadd.xlane.f32.xlu0 %v85_v28 }
  0x22   :  { %89 = vadd.xlane.f32.xlu1 %v88_v29 }
  0x25   :  { %92 = vadd.xlane.f32.xlu0 %v91_v34 }
  0x26   :  { %95 = vadd.xlane.f32.xlu1 %v94_v35 }
  0x29   :  { %98 = vadd.xlane.f32.xlu0 %v97_v41 }
  0x2a   :  { %101 = vadd.xlane.f32.xlu1 %v100_v42 }
  0x2d   :  { %104 = vadd.xlane.f32.xlu0 %v103_v47 }
  0x2e   :  { %107 = vadd.xlane.f32.xlu1 %v106_v48 }
  0x9a   :  { %v63_v62 = vpop.xlane.xlu0 %62 }
  0x9b   :  { %v69_v0 = vpop.xlane.xlu1 %68  ;;  %v128_v1 = vrot.slane %v63_v62, %v1695_v54  ;;  %v132_v2 = vrot.slane %v63_v62, %v1698_v55  ;;  %v136_v3 = vrot.slane %v63_v62, %v1701_v56  ;;  %v140_v4 = vrot.slane %v63_v62, %v1704_v57 }
  0x9c   :  { %v144_v5 = vrot.slane %v63_v62, %v1707_v58  ;;  %v148_v6 = vrot.slane %v63_v62, %v1710_v59  ;;  %v152_v7 = vrot.slane %v63_v62, %v1713_v60  ;;  %v156_v8 = vrot.slane %v63_v62, %v1716_v61 }
  0x9d   :  { %v637_v9 = vcombine.low %v128_v1, %v132_v2  ;;  %v638_v10 = vcombine.low %v136_v3, %v140_v4  ;;  %v192_v11 = vrot.slane %v69_v0, %v1695_v54  ;;  %v196_v12 = vrot.slane %v69_v0, %v1698_v55 }
  0x9e   :  { %v66_v13 = vpop.xlane.xlu0 %65  ;;  %v639_v14 = vcombine.low %v144_v5, %v148_v6  ;;  %v640_v15 = vcombine.low %v152_v7, %v156_v8  ;;  %v200_v16 = vrot.slane %v69_v0, %v1701_v56  ;;  %v204_v17 = vrot.slane %v69_v0, %v1704_v57 }
  0x9f   :  { %v1733_v18 = vpop.xlane.xlu1 %71  ;;  %v647_v19 = vrot.slane %v637_v9, %v1719_v63  ;;  %v654_v20 = vrot.slane %v638_v10, %v1719_v63  ;;  %v160_v21 = vrot.slane %v66_v13, %v1695_v54  ;;  %v164_v22 = vrot.slane %v66_v13, %v1698_v55 }
  0xa0   :  { %v661_v23 = vrot.slane %v639_v14, %v1719_v63  ;;  %v668_v24 = vrot.slane %v640_v15, %v1719_v63  ;;  %v168_v25 = vrot.slane %v66_v13, %v1701_v56  ;;  %v172_v26 = vrot.slane %v66_v13, %v1704_v57 }
  0xa1   :  { %v669_v27 = vcombine.low %v647_v19, %v654_v20  ;;  %v176_v28 = vrot.slane %v66_v13, %v1707_v58  ;;  %v180_v29 = vrot.slane %v66_v13, %v1710_v59  ;;  %v184_v30 = vrot.slane %v66_v13, %v1713_v60 }
  0xa2   :  { %v670_v31 = vcombine.low %v661_v23, %v668_v24  ;;  %v188_v32 = vrot.slane %v66_v13, %v1716_v61  ;;  %v686_v33 = vcombine.low %v160_v21, %v164_v22  ;;  %v687_v34 = vcombine.low %v168_v25, %v172_v26 }
  0xa3   :  { %v1747_v35 = vpop.xlane.xlu1 %77  ;;  %v677_v36 = vrot.slane %v669_v27, %v1719_v63  ;;  %v688_v37 = vcombine.low %v176_v28, %v180_v29  ;;  %v208_v38 = vrot.slane %v69_v0, %v1707_v58  ;;  %v212_v39 = vrot.slane %v69_v0, %v1710_v59 }
  0xa4   :  { %v684_v40 = vrot.slane %v670_v31, %v1719_v63  ;;  %v689_v41 = vcombine.low %v184_v30, %v188_v32  ;;  %v696_v42 = vrot.slane %v686_v33, %v1719_v63  ;;  %v703_v43 = vrot.slane %v687_v34, %v1719_v63 }
  0xa5   :  { %v710_v44 = vrot.slane %v688_v37, %v1719_v63  ;;  %v216_v45 = vrot.slane %v69_v0, %v1713_v60  ;;  %v220_v46 = vrot.slane %v69_v0, %v1716_v61  ;;  %v735_v47 = vcombine.low %v192_v11, %v196_v12  ;;  %v75_v12 = vpop.xlane.xlu0 %74 }
  0xa6   :  { %v685_v48 = vcombine.low %v677_v36, %v684_v40  ;;  %v717_v50 = vrot.slane %v689_v41, %v1719_v63  ;;  %v718_v51 = vcombine.low %v696_v42, %v703_v43  ;;  %v736_v53 = vcombine.low %v200_v16, %v204_v17 }
  0xa7   :  { %v737_v62 = vcombine.low %v208_v38, %v212_v39  ;;  %v738_v1 = vcombine.low %v216_v45, %v220_v46  ;;  %v745_v2 = vrot.slane %v735_v47, %v1719_v63  ;;  %v224_v3 = vrot.slane %v1733_v18, %v1695_v54  ;;  %v1762_v4 = vpop.xlane.xlu1 %83 }
  0xa8   :  { %1422 = vperm.xlu0 %1625, %v685_v48   ;;  %v719_v5 = vcombine.low %v710_v44, %v717_v50  ;;  %v726_v6 = vrot.slane %v718_v51, %v1719_v63  ;;  %v752_v0 = vrot.slane %v736_v53, %v1719_v63  ;;  %v228_v7 = vrot.slane %v1733_v18, %v1698_v55 }
  0xa9   :  { %v759_v8 = vrot.slane %v737_v62, %v1719_v63  ;;  %v766_v9 = vrot.slane %v738_v1, %v1719_v63  ;;  %v232_v10 = vrot.slane %v1733_v18, %v1701_v56  ;;  %v236_v11 = vrot.slane %v1733_v18, %v1704_v57 }
  0xaa   :  { %v733_v13 = vrot.slane %v719_v5, %v1719_v63  ;;  %v767_v14 = vcombine.low %v745_v2, %v752_v0  ;;  %v240_v15 = vrot.slane %v1733_v18, %v1707_v58  ;;  %v244_v16 = vrot.slane %v1733_v18, %v1710_v59 }
  0xab   :  { %v768_v17 = vcombine.low %v759_v8, %v766_v9  ;;  %v248_v19 = vrot.slane %v1733_v18, %v1713_v60  ;;  %v252_v20 = vrot.slane %v1733_v18, %v1716_v61  ;;  %v784_v21 = vcombine.low %v224_v3, %v228_v7  ;;  %v90_v30 = vpop.xlane.xlu1 %89 }
  0xac   :  { %v734_v22 = vcombine.low %v726_v6, %v733_v13  ;;  %v775_v23 = vrot.slane %v767_v14, %v1719_v63  ;;  %v785_v24 = vcombine.low %v232_v10, %v236_v11  ;;  %v786_v25 = vcombine.low %v240_v15, %v244_v16 }
  0xad   :  { %v782_v26 = vrot.slane %v768_v17, %v1719_v63  ;;  %v787_v27 = vcombine.low %v248_v19, %v252_v20  ;;  %v794_v28 = vrot.slane %v784_v21, %v1719_v63  ;;  %v256_v29 = vrot.slane %v75_v12, %v1695_v54 }
  0xae   :  { %1425 = vperm.xlu1 %1626, %v734_v22   ;;  %v801_v31 = vrot.slane %v785_v24, %v1719_v63  ;;  %v808_v32 = vrot.slane %v786_v25, %v1719_v63  ;;  %v260_v18 = vrot.slane %v75_v12, %v1698_v55  ;;  %v264_v33 = vrot.slane %v75_v12, %v1701_v56 }
  0xaf   :  { %v783_v34 = vcombine.low %v775_v23, %v782_v26  ;;  %v815_v36 = vrot.slane %v787_v27, %v1719_v63  ;;  %v268_v37 = vrot.slane %v75_v12, %v1704_v57  ;;  %v272_v38 = vrot.slane %v75_v12, %v1707_v58  ;;  %v96_v24 = vpop.xlane.xlu1 %95 }
  0xb0   :  { %v816_v39 = vcombine.low %v794_v28, %v801_v31  ;;  %v276_v40 = vrot.slane %v75_v12, %v1710_v59  ;;  %v280_v41 = vrot.slane %v75_v12, %v1713_v60  ;;  %v284_v42 = vrot.slane %v75_v12, %v1716_v61 }
  0xb1   :  { %v817_v43 = vcombine.low %v808_v32, %v815_v36  ;;  %v833_v44 = vcombine.low %v256_v29, %v260_v18  ;;  %v834_v45 = vcombine.low %v264_v33, %v268_v37  ;;  %v416_v46 = vrot.slane %v90_v30, %v1695_v54 }
  0xb2   :  { %1428 = vperm.xlu1 %1626, %v783_v34   ;;  %v824_v47 = vrot.slane %v816_v39, %v1719_v63  ;;  %v835_v48 = vcombine.low %v272_v38, %v276_v40  ;;  %v836_v50 = vcombine.low %v280_v41, %v284_v42  ;;  %v420_v51 = vrot.slane %v90_v30, %v1698_v55 }
  0xb3   :  { %v831_v53 = vrot.slane %v817_v43, %v1719_v63  ;;  %v843_v62 = vrot.slane %v833_v44, %v1719_v63  ;;  %v850_v1 = vrot.slane %v834_v45, %v1719_v63  ;;  %v424_v2 = vrot.slane %v90_v30, %v1701_v56 }
  0xb4   :  { %v857_v3 = vrot.slane %v835_v48, %v1719_v63  ;;  %v864_v5 = vrot.slane %v836_v50, %v1719_v63  ;;  %v428_v6 = vrot.slane %v90_v30, %v1704_v57  ;;  %v432_v0 = vrot.slane %v90_v30, %v1707_v58  ;;  %v81_v48 = vpop.xlane.xlu0 %80 }
  0xb5   :  { %v832_v7 = vcombine.low %v824_v47, %v831_v53  ;;  %v865_v8 = vcombine.low %v843_v62, %v850_v1  ;;  %v436_v9 = vrot.slane %v90_v30, %v1710_v59  ;;  %v440_v10 = vrot.slane %v90_v30, %v1713_v60 }
  0xb6   :  { %v866_v11 = vcombine.low %v857_v3, %v864_v5  ;;  %v444_v12 = vrot.slane %v90_v30, %v1716_v61  ;;  %v1078_v13 = vcombine.low %v416_v46, %v420_v51  ;;  %v1079_v14 = vcombine.low %v424_v2, %v428_v6 }
  0xb7   :  { %1431 = vperm.xlu1 %1626, %v832_v7   ;;  %v873_v15 = vrot.slane %v865_v8, %v1719_v63  ;;  %v1080_v16 = vcombine.low %v432_v0, %v436_v9  ;;  %v288_v17 = vrot.slane %v1747_v35, %v1695_v54  ;;  %v292_v19 = vrot.slane %v1747_v35, %v1698_v55 }
  0xb8   :  { %v880_v20 = vrot.slane %v866_v11, %v1719_v63  ;;  %v1081_v21 = vcombine.low %v440_v10, %v444_v12  ;;  %v1088_v22 = vrot.slane %v1078_v13, %v1719_v63  ;;  %v1095_v23 = vrot.slane %v1079_v14, %v1719_v63 }
  0xb9   :  { %v1102_v25 = vrot.slane %v1080_v16, %v1719_v63  ;;  %v296_v26 = vrot.slane %v1747_v35, %v1701_v56  ;;  %v300_v27 = vrot.slane %v1747_v35, %v1704_v57  ;;  %v304_v28 = vrot.slane %v1747_v35, %v1707_v58 }
  0xba   :  { %v881_v29 = vcombine.low %v873_v15, %v880_v20  ;;  %v1109_v30 = vrot.slane %v1081_v21, %v1719_v63  ;;  %v1110_v31 = vcombine.low %v1088_v22, %v1095_v23  ;;  %v308_v32 = vrot.slane %v1747_v35, %v1710_v59 }
  0xbb   :  { %v312_v18 = vrot.slane %v1747_v35, %v1713_v60  ;;  %v316_v33 = vrot.slane %v1747_v35, %v1716_v61  ;;  %v882_v34 = vcombine.low %v288_v17, %v292_v19  ;;  %v883_v36 = vcombine.low %v296_v26, %v300_v27  ;;  %v102_v17 = vpop.xlane.xlu1 %101 }
  0xbc   :  { %1434 = vperm.xlu1 %1626, %v881_v29   ;;  %v1111_v37 = vcombine.low %v1102_v25, %v1109_v30  ;;  %v1118_v38 = vrot.slane %v1110_v31, %v1719_v63  ;;  %v884_v39 = vcombine.low %v304_v28, %v308_v32  ;;  %v480_v40 = vrot.slane %v96_v24, %v1695_v54 }
  0xbd   :  { %v885_v41 = vcombine.low %v312_v18, %v316_v33  ;;  %v892_v42 = vrot.slane %v882_v34, %v1719_v63  ;;  %v899_v43 = vrot.slane %v883_v36, %v1719_v63  ;;  %v484_v44 = vrot.slane %v96_v24, %v1698_v55 }
  0xbe   :  { %v1125_v45 = vrot.slane %v1111_v37, %v1719_v63  ;;  %v906_v35 = vrot.slane %v884_v39, %v1719_v63  ;;  %v488_v46 = vrot.slane %v96_v24, %v1701_v56  ;;  %v492_v47 = vrot.slane %v96_v24, %v1704_v57 }
  0xbf   :  { %v913_v50 = vrot.slane %v885_v41, %v1719_v63  ;;  %v914_v51 = vcombine.low %v892_v42, %v899_v43  ;;  %v496_v53 = vrot.slane %v96_v24, %v1707_v58  ;;  %v500_v62 = vrot.slane %v96_v24, %v1710_v59 }
  0xc0   :  { %v1126_v1 = vcombine.low %v1118_v38, %v1125_v45  ;;  %v504_v2 = vrot.slane %v96_v24, %v1713_v60  ;;  %v508_v3 = vrot.slane %v96_v24, %v1716_v61  ;;  %v1176_v5 = vcombine.low %v480_v40, %v484_v44 }
  0xc1   :  { %v915_v6 = vcombine.low %v906_v35, %v913_v50  ;;  %v922_v0 = vrot.slane %v914_v51, %v1719_v63  ;;  %v1177_v7 = vcombine.low %v488_v46, %v492_v47  ;;  %v1178_v8 = vcombine.low %v496_v53, %v500_v62 }
  0xc2   :  { %1449 = vperm.xlu0 %1625, %v1126_v1   ;;  %v1179_v9 = vcombine.low %v504_v2, %v508_v3  ;;  %v1186_v10 = vrot.slane %v1176_v5, %v1719_v63  ;;  %v320_v11 = vrot.slane %v81_v48, %v1695_v54  ;;  %v324_v12 = vrot.slane %v81_v48, %v1698_v55 }
  0xc3   :  { %v929_v13 = vrot.slane %v915_v6, %v1719_v63  ;;  %v1193_v14 = vrot.slane %v1177_v7, %v1719_v63  ;;  %v1200_v15 = vrot.slane %v1178_v8, %v1719_v63  ;;  %v328_v16 = vrot.slane %v81_v48, %v1701_v56 }
  0xc4   :  { %v1207_v19 = vrot.slane %v1179_v9, %v1719_v63  ;;  %v332_v20 = vrot.slane %v81_v48, %v1704_v57  ;;  %v336_v21 = vrot.slane %v81_v48, %v1707_v58  ;;  %v340_v22 = vrot.slane %v81_v48, %v1710_v59 }
  0xc5   :  { %v930_v23 = vcombine.low %v922_v0, %v929_v13  ;;  %v1208_v24 = vcombine.low %v1186_v10, %v1193_v14  ;;  %v344_v25 = vrot.slane %v81_v48, %v1713_v60  ;;  %v348_v26 = vrot.slane %v81_v48, %v1716_v61  ;;  %v108_v0 = vpop.xlane.xlu1 %107 }
  0xc6   :  { %v1209_v27 = vcombine.low %v1200_v15, %v1207_v19  ;;  %v931_v28 = vcombine.low %v320_v11, %v324_v12  ;;  %v932_v29 = vcombine.low %v328_v16, %v332_v20  ;;  %v933_v30 = vcombine.low %v336_v21, %v340_v22  ;;  %v87_v20 = vpop.xlane.xlu0 %86 }
  0xc7   :  { %1437 = vperm.xlu1 %1626, %v930_v23   ;;  %v1216_v31 = vrot.slane %v1208_v24, %v1719_v63  ;;  %v934_v32 = vcombine.low %v344_v25, %v348_v26  ;;  %v544_v18 = vrot.slane %v102_v17, %v1695_v54  ;;  %v548_v33 = vrot.slane %v102_v17, %v1698_v55 }
  0xc8   :  { %v1223_v34 = vrot.slane %v1209_v27, %v1719_v63  ;;  %v941_v36 = vrot.slane %v931_v28, %v1719_v63  ;;  %v948_v37 = vrot.slane %v932_v29, %v1719_v63  ;;  %v955_v38 = vrot.slane %v933_v30, %v1719_v63 }
  0xc9   :  { %v962_v39 = vrot.slane %v934_v32, %v1719_v63  ;;  %v552_v40 = vrot.slane %v102_v17, %v1701_v56  ;;  %v556_v41 = vrot.slane %v102_v17, %v1704_v57  ;;  %v560_v42 = vrot.slane %v102_v17, %v1707_v58 }
  0xca   :  { %v1224_v43 = vcombine.low %v1216_v31, %v1223_v34  ;;  %v963_v44 = vcombine.low %v941_v36, %v948_v37  ;;  %v564_v45 = vrot.slane %v102_v17, %v1710_v59  ;;  %v568_v35 = vrot.slane %v102_v17, %v1713_v60 }
  0xcb   :  { %v964_v46 = vcombine.low %v955_v38, %v962_v39  ;;  %v572_v47 = vrot.slane %v102_v17, %v1716_v61  ;;  %v1274_v48 = vcombine.low %v544_v18, %v548_v33  ;;  %v1275_v50 = vcombine.low %v552_v40, %v556_v41 }
  0xcc   :  { %1455 = vperm.xlu0 %1625, %v1224_v43   ;;  %v971_v51 = vrot.slane %v963_v44, %v1719_v63  ;;  %v1276_v53 = vcombine.low %v560_v42, %v564_v45  ;;  %v352_v62 = vrot.slane %v1762_v4, %v1695_v54  ;;  %v356_v1 = vrot.slane %v1762_v4, %v1698_v55  ;;  %v93_v44 = vpop.xlane.xlu0 %92 }
  0xcd   :  { %v978_v2 = vrot.slane %v964_v46, %v1719_v63  ;;  %v1277_v3 = vcombine.low %v568_v35, %v572_v47  ;;  %v1284_v5 = vrot.slane %v1274_v48, %v1719_v63  ;;  %v1291_v6 = vrot.slane %v1275_v50, %v1719_v63 }
  0xce   :  { %v1298_v7 = vrot.slane %v1276_v53, %v1719_v63  ;;  %v360_v8 = vrot.slane %v1762_v4, %v1701_v56  ;;  %v364_v9 = vrot.slane %v1762_v4, %v1704_v57  ;;  %v368_v10 = vrot.slane %v1762_v4, %v1707_v58 }
  0xcf   :  { %v979_v11 = vcombine.low %v971_v51, %v978_v2  ;;  %v1305_v12 = vrot.slane %v1277_v3, %v1719_v63  ;;  %v1306_v13 = vcombine.low %v1284_v5, %v1291_v6  ;;  %v372_v14 = vrot.slane %v1762_v4, %v1710_v59 }
  0xd0   :  { %v376_v15 = vrot.slane %v1762_v4, %v1713_v60  ;;  %v380_v16 = vrot.slane %v1762_v4, %v1716_v61  ;;  %v980_v17 = vcombine.low %v352_v62, %v356_v1  ;;  %v981_v19 = vcombine.low %v360_v8, %v364_v9 }
  0xd1   :  { %1440 = vperm.xlu1 %1626, %v979_v11   ;;  %v1307_v21 = vcombine.low %v1298_v7, %v1305_v12  ;;  %v1314_v22 = vrot.slane %v1306_v13, %v1719_v63  ;;  %v982_v23 = vcombine.low %v368_v10, %v372_v14  ;;  %v608_v24 = vrot.slane %v108_v0, %v1695_v54 }
  0xd2   :  { %v983_v25 = vcombine.low %v376_v15, %v380_v16  ;;  %v990_v26 = vrot.slane %v980_v17, %v1719_v63  ;;  %v997_v27 = vrot.slane %v981_v19, %v1719_v63  ;;  %v612_v28 = vrot.slane %v108_v0, %v1698_v55  ;;  %v99_v16 = vpop.xlane.xlu0 %98 }
  0xd3   :  { %v1321_v29 = vrot.slane %v1307_v21, %v1719_v63  ;;  %v1004_v4 = vrot.slane %v982_v23, %v1719_v63  ;;  %v616_v30 = vrot.slane %v108_v0, %v1701_v56  ;;  %v620_v31 = vrot.slane %v108_v0, %v1704_v57 }
  0xd4   :  { %v1011_v32 = vrot.slane %v983_v25, %v1719_v63  ;;  %v1012_v18 = vcombine.low %v990_v26, %v997_v27  ;;  %v624_v33 = vrot.slane %v108_v0, %v1707_v58  ;;  %v628_v34 = vrot.slane %v108_v0, %v1710_v59 }
  0xd5   :  { %v1322_v36 = vcombine.low %v1314_v22, %v1321_v29  ;;  %v632_v37 = vrot.slane %v108_v0, %v1713_v60  ;;  %v636_v38 = vrot.slane %v108_v0, %v1716_v61  ;;  %v1372_v39 = vcombine.low %v608_v24, %v612_v28 }
  0xd6   :  { %v1013_v40 = vcombine.low %v1004_v4, %v1011_v32  ;;  %v1020_v41 = vrot.slane %v1012_v18, %v1719_v63  ;;  %v1373_v42 = vcombine.low %v616_v30, %v620_v31  ;;  %v1374_v43 = vcombine.low %v624_v33, %v628_v34 }
  0xd7   :  { %1461 = vperm.xlu0 %1625, %v1322_v36   ;;  %v1375_v45 = vcombine.low %v632_v37, %v636_v38  ;;  %v1382_v35 = vrot.slane %v1372_v39, %v1719_v63  ;;  %v384_v46 = vrot.slane %v87_v20, %v1695_v54  ;;  %v388_v47 = vrot.slane %v87_v20, %v1698_v55 }
  0xd8   :  { %v1027_v48 = vrot.slane %v1013_v40, %v1719_v63  ;;  %v1389_v50 = vrot.slane %v1373_v42, %v1719_v63  ;;  %v1396_v51 = vrot.slane %v1374_v43, %v1719_v63  ;;  %v392_v53 = vrot.slane %v87_v20, %v1701_v56 }
  0xd9   :  { %v1403_v62 = vrot.slane %v1375_v45, %v1719_v63  ;;  %v396_v1 = vrot.slane %v87_v20, %v1704_v57  ;;  %v400_v2 = vrot.slane %v87_v20, %v1707_v58  ;;  %v404_v3 = vrot.slane %v87_v20, %v1710_v59 }
  0xda   :  { %v1028_v5 = vcombine.low %v1020_v41, %v1027_v48  ;;  %v1404_v6 = vcombine.low %v1382_v35, %v1389_v50  ;;  %v408_v0 = vrot.slane %v87_v20, %v1713_v60  ;;  %v412_v7 = vrot.slane %v87_v20, %v1716_v61  ;;  %v105_v41 = vpop.xlane.xlu0 %104 }
  0xdb   :  { %v1405_v8 = vcombine.low %v1396_v51, %v1403_v62  ;;  %v1029_v9 = vcombine.low %v384_v46, %v388_v47  ;;  %v1030_v10 = vcombine.low %v392_v53, %v396_v1  ;;  %v1031_v11 = vcombine.low %v400_v2, %v404_v3 }
  0xdc   :  { %1443 = vperm.xlu1 %1626, %v1028_v5   ;;  %v1412_v12 = vrot.slane %v1404_v6, %v1719_v63  ;;  %v1032_v13 = vcombine.low %v408_v0, %v412_v7  ;;  %v448_v14 = vrot.slane %v93_v44, %v1695_v54  ;;  %v452_v15 = vrot.slane %v93_v44, %v1698_v55 }
  0xdd   :  { %v1419_v17 = vrot.slane %v1405_v8, %v1719_v63  ;;  %v1039_v19 = vrot.slane %v1029_v9, %v1719_v63  ;;  %v1046_v21 = vrot.slane %v1030_v10, %v1719_v63  ;;  %v1053_v20 = vrot.slane %v1031_v11, %v1719_v63 }
  0xde   :  { %v1060_v22 = vrot.slane %v1032_v13, %v1719_v63  ;;  %v456_v23 = vrot.slane %v93_v44, %v1701_v56  ;;  %v460_v24 = vrot.slane %v93_v44, %v1704_v57  ;;  %v464_v25 = vrot.slane %v93_v44, %v1707_v58 }
  0xdf   :  { %v1420_v26 = vcombine.low %v1412_v12, %v1419_v17  ;;  %v1061_v27 = vcombine.low %v1039_v19, %v1046_v21  ;;  %v468_v28 = vrot.slane %v93_v44, %v1710_v59  ;;  %v472_v29 = vrot.slane %v93_v44, %v1713_v60 }
  0xe0   :  { %v1062_v4 = vcombine.low %v1053_v20, %v1060_v22  ;;  %v476_v30 = vrot.slane %v93_v44, %v1716_v61  ;;  %v1127_v31 = vcombine.low %v448_v14, %v452_v15  ;;  %v1128_v32 = vcombine.low %v456_v23, %v460_v24 }
  0xe1   :  { %1467 = vperm.xlu0 %1625, %v1420_v26   ;;  %v1069_v18 = vrot.slane %v1061_v27, %v1719_v63  ;;  %v1129_v33 = vcombine.low %v464_v25, %v468_v28  ;;  %v512_v34 = vrot.slane %v99_v16, %v1695_v54  ;;  %v516_v36 = vrot.slane %v99_v16, %v1698_v55 }
  0xe2   :  { %v1076_v37 = vrot.slane %v1062_v4, %v1719_v63  ;;  %v1130_v38 = vcombine.low %v472_v29, %v476_v30  ;;  %v1137_v39 = vrot.slane %v1127_v31, %v1719_v63  ;;  %v1144_v40 = vrot.slane %v1128_v32, %v1719_v63 }
  0xe3   :  { %v1151_v42 = vrot.slane %v1129_v33, %v1719_v63  ;;  %v520_v43 = vrot.slane %v99_v16, %v1701_v56  ;;  %v524_v44 = vrot.slane %v99_v16, %v1704_v57  ;;  %v528_v45 = vrot.slane %v99_v16, %v1707_v58 }
  0xe4   :  { %v1077_v35 = vcombine.low %v1069_v18, %v1076_v37  ;;  %v1158_v46 = vrot.slane %v1130_v38, %v1719_v63  ;;  %v1159_v47 = vcombine.low %v1137_v39, %v1144_v40  ;;  %v532_v48 = vrot.slane %v99_v16, %v1710_v59 }
  0xe5   :  { %v536_v50 = vrot.slane %v99_v16, %v1713_v60  ;;  %v540_v51 = vrot.slane %v99_v16, %v1716_v61  ;;  %v1225_v53 = vcombine.low %v512_v34, %v516_v36  ;;  %v1226_v62 = vcombine.low %v520_v43, %v524_v44 }
  0xe6   :  { %1446 = vperm.xlu1 %1626, %v1077_v35   ;;  %v1160_v1 = vcombine.low %v1151_v42, %v1158_v46  ;;  %v1167_v2 = vrot.slane %v1159_v47, %v1719_v63  ;;  %v1227_v3 = vcombine.low %v528_v45, %v532_v48  ;;  %v576_v5 = vrot.slane %v105_v41, %v1695_v54 }
  0xe7   :  { %v1228_v6 = vcombine.low %v536_v50, %v540_v51  ;;  %v1235_v0 = vrot.slane %v1225_v53, %v1719_v63  ;;  %v1242_v7 = vrot.slane %v1226_v62, %v1719_v63  ;;  %v580_v8 = vrot.slane %v105_v41, %v1698_v55 }
  0xe8   :  { %v1174_v9 = vrot.slane %v1160_v1, %v1719_v63  ;;  %v1249_v10 = vrot.slane %v1227_v3, %v1719_v63  ;;  %v584_v11 = vrot.slane %v105_v41, %v1701_v56  ;;  %v588_v12 = vrot.slane %v105_v41, %v1704_v57 }
  0xe9   :  { %v1256_v13 = vrot.slane %v1228_v6, %v1719_v63  ;;  %v1257_v14 = vcombine.low %v1235_v0, %v1242_v7  ;;  %v592_v54 = vrot.slane %v105_v41, %v1707_v58  ;;  %v596_v15 = vrot.slane %v105_v41, %v1710_v59 }
  0xea   :  { %v1175_v16 = vcombine.low %v1167_v2, %v1174_v9  ;;  %v600_v17 = vrot.slane %v105_v41, %v1713_v60  ;;  %v604_v55 = vrot.slane %v105_v41, %v1716_v61  ;;  %v1323_v19 = vcombine.low %v576_v5, %v580_v8 }
  0xeb   :  { %v1258_v21 = vcombine.low %v1249_v10, %v1256_v13  ;;  %v1265_v20 = vrot.slane %v1257_v14, %v1719_v63  ;;  %v1324_v22 = vcombine.low %v584_v11, %v588_v12  ;;  %v1325_v56 = vcombine.low %v592_v54, %v596_v15 }
  0xec   :  { %1452 = vperm.xlu1 %1626, %v1175_v16   ;;  %v1326_v57 = vcombine.low %v600_v17, %v604_v55  ;;  %v1333_v23 = vrot.slane %v1323_v19, %v1719_v63  ;;  %v1676_v4 = vmov 0.0   ;;  %v1976_v34 = vand.u32 127, %v125_v49 }
  0xed   :  { %v1272_v24 = vrot.slane %v1258_v21, %v1719_v63  ;;  %v1340_v58 = vrot.slane %v1324_v22, %v1719_v63  ;;  %v1347_v59 = vrot.slane %v1325_v56, %v1719_v63  ;;  %27 = vst [vmem:[#allocation2] sm:$0x1] %v1676_v4 }
  0xee   :  { %v1354_v60 = vrot.slane %v1326_v57, %v1719_v63  ;;  %v1475_v36 = vadd.s32 4294967288, %v1976_v34  ;;  %v1482_v38 = vadd.s32 4294967280, %v1976_v34  ;;  %v1489_v39 = vadd.s32 4294967272, %v1976_v34 }
  0xef   :  { %v1273_v25 = vcombine.low %v1265_v20, %v1272_v24  ;;  %v1355_v61 = vcombine.low %v1333_v23, %v1340_v58  ;;  %v1496_v40 = vadd.s32 4294967264, %v1976_v34  ;;  %v1503_v42 = vadd.s32 4294967256, %v1976_v34 }
  0xf0   :  { %v1356_v26 = vcombine.low %v1347_v59, %v1354_v60  ;;  %v1478_v41 = vsub.s32 %v1475_v36, %v1692_v52  ;;  %v1485_v44 = vsub.s32 %v1482_v38, %v1692_v52  ;;  %v1510_v45 = vadd.s32 4294967248, %v1976_v34 }
  0xf1   :  { %1458 = vperm.xlu1 %1626, %v1273_v25   ;;  %v1363_v27 = vrot.slane %v1355_v61, %v1719_v63  ;;  %v1473_v49 = vsub.s32 %v1976_v34, %v1692_v52  ;;  %v1492_v35 = vsub.s32 %v1489_v39, %v1692_v52  ;;  %v1517_v46 = vadd.s32 4294967240, %v1976_v34 }
  0xf2   :  { %v1370_v28 = vrot.slane %v1356_v26, %v1719_v63  ;;  %v1499_v48 = vsub.s32 %v1496_v40, %v1692_v52  ;;  %v1524_v50 = vadd.s32 4294967232, %v1976_v34  ;;  %v1506_v53 = vsub.s32 %v1503_v42, %v1692_v52 }
  0xf3   :  { %v1513_v2 = vsub.s32 %v1510_v45, %v1692_v52  ;;  %v1520_v6 = vsub.s32 %v1517_v46, %v1692_v52  ;;  %v1538_v8 = vadd.s32 4294967216, %v1976_v34  ;;  %v1531_v10 = vadd.s32 4294967224, %v1976_v34 }
  0xf4   :  { %v1371_v29 = vcombine.low %v1363_v27, %v1370_v28  ;;  %v1527_v7 = vsub.s32 %v1524_v50, %v1692_v52  ;;  %v1545_v15 = vadd.s32 4294967208, %v1976_v34  ;;  %v1552_v56 = vadd.s32 4294967200, %v1976_v34  ;;  %v60_v46 = vld [vmem:[#allocation2] sm:$0x1] }
  0xf5   :  { %v1541_v21 = vsub.s32 %v1538_v8, %v1692_v52  ;;  %v1534_v20 = vsub.s32 %v1531_v10, %v1692_v52  ;;  %v1559_v58 = vadd.s32 4294967192, %v1976_v34  ;;  %v1566_v28 = vadd.s32 4294967184, %v1976_v34 }
  0xf6   :  { %1464 = vperm.xlu1 %1626, %v1371_v29   ;;  %v1548_v61 = vsub.s32 %v1545_v15, %v1692_v52  ;;  %v1555_v26 = vsub.s32 %v1552_v56, %v1692_v52  ;;  %v1573_v29 = vadd.s32 4294967176, %v1976_v34 }
  0xf7   :  { %v1569_v36 = vsub.s32 %v1566_v28, %v1692_v52 }
 0x123   :  { %v1423_v43 = vpop.permute.xlu0 %1422 }
 0x124   :  { %v1474_v3 = vrot.slane %v1423_v43, %v1473_v49 }
 0x129   :  { %v1426_v30 = vpop.permute.xlu1 %1425 }
 0x12a   :  { %v1479_v51 = vrot.slane %v1426_v30, %v1478_v41 }
 0x12c   :  { %v1481_v9 = vsel %vm1480_vm0, %v1479_v51, %v1474_v3 }
 0x12d   :  { %v1429_v31 = vpop.permute.xlu1 %1428 }
 0x12e   :  { %v1486_v62 = vrot.slane %v1429_v31, %v1485_v44 }
 0x130   :  { %v1488_v13 = vsel %vm1487_vm1, %v1486_v62, %v1481_v9 }
 0x132   :  { %v1432_v32 = vpop.permute.xlu1 %1431 }
 0x133   :  { %v1493_v5 = vrot.slane %v1432_v32, %v1492_v35 }
 0x135   :  { %v1495_v54 = vsel %vm1494_vm2, %v1493_v5, %v1488_v13 }
 0x137   :  { %v1435_v18 = vpop.permute.xlu1 %1434 }
 0x138   :  { %v1500_v0 = vrot.slane %v1435_v18, %v1499_v48  ;;  %v1562_v18 = vsub.s32 %v1559_v58, %v1692_v52 }
 0x13a   :  { %v1502_v17 = vsel %vm1501_vm3, %v1500_v0, %v1495_v54 }
 0x13d   :  { %v1450_v1 = vpop.permute.xlu0 %1449 }
 0x13e   :  { %v1535_v25 = vrot.slane %v1450_v1, %v1534_v20 }
 0x142   :  { %v1438_v33 = vpop.permute.xlu1 %1437 }
 0x143   :  { %v1507_v11 = vrot.slane %v1438_v33, %v1506_v53 }
 0x145   :  { %v1509_v22 = vsel %vm1508_vm4, %v1507_v11, %v1502_v17 }
 0x147   :  { %v1456_v55 = vpop.permute.xlu0 %1455 }
 0x148   :  { %v1549_v32 = vrot.slane %v1456_v55, %v1548_v61 }
 0x14c   :  { %v1441_v37 = vpop.permute.xlu1 %1440 }
 0x14d   :  { %v1514_v14 = vrot.slane %v1441_v37, %v1513_v2  ;;  %v1576_v37 = vsub.s32 %v1573_v29, %v1692_v52 }
 0x14f   :  { %v1516_v57 = vsel %vm1515_vm5, %v1514_v14, %v1509_v22 }
 0x152   :  { %v1462_v27 = vpop.permute.xlu0 %1461 }
 0x153   :  { %v1563_v41 = vrot.slane %v1462_v27, %v1562_v18 }
 0x157   :  { %v1444_v47 = vpop.permute.xlu1 %1443 }
 0x158   :  { %v1521_v16 = vrot.slane %v1444_v47, %v1520_v6 }
 0x15a   :  { %v1523_v23 = vsel %vm1522_vm6, %v1521_v16, %v1516_v57 }
 0x15c   :  { %v1468_v39 = vpop.permute.xlu0 %1467 }
 0x15d   :  { %v1577_v43 = vrot.slane %v1468_v39, %v1576_v37 }
 0x161   :  { %v1447_v12 = vpop.permute.xlu1 %1446 }
 0x162   :  { %v1528_v19 = vrot.slane %v1447_v12, %v1527_v7 }
 0x164   :  { %v1530_v59 = vsel %vm1529_vm7, %v1528_v19, %v1523_v23 }
 0x165   :  { %v1537_v4 = vsel %vm1536_vm8, %v1535_v25, %v1530_v59 }
 0x167   :  { %v1453_v24 = vpop.permute.xlu1 %1452 }
 0x168   :  { %v1542_v60 = vrot.slane %v1453_v24, %v1541_v21 }
 0x16a   :  { %v1544_v30 = vsel %vm1543_vm9, %v1542_v60, %v1537_v4 }
 0x16b   :  { %v1551_v38 = vsel %vm1550_vm10, %v1549_v32, %v1544_v30 }
 0x16c   :  { %v1459_v31 = vpop.permute.xlu1 %1458 }
 0x16d   :  { %v1556_v33 = vrot.slane %v1459_v31, %v1555_v26 }
 0x16f   :  { %v1558_v40 = vsel %vm1557_vm11, %v1556_v33, %v1551_v38 }
 0x170   :  { %v1565_v44 = vsel %vm1564_vm12, %v1563_v41, %v1558_v40 }
 0x171   :  { %v1465_v34 = vpop.permute.xlu1 %1464 }
 0x172   :  { %v1570_v42 = vrot.slane %v1465_v34, %v1569_v36 }
 0x174   :  { %v1572_v45 = vsel %vm1571_vm13, %v1570_v42, %v1565_v44 }
 0x175   :  { %v1579_v49 = vsel %vm1578_vm14, %v1577_v43, %v1572_v45 }
 0x176   :  { %v1586_v35 = vrot.slane %v1579_v49, %v1719_v63 }
 0x178   :  { %v1593_v47 = vrot.slane %v1586_v35, %v1719_v63 }
 0x17a   :  { %v1595_v48 = vadd.f32 %v1593_v47, %v60_v46 }
 0x17c   :  { %1596 = vst [vmem:[#allocation2] sm:$0x1] %v1595_v48 }
 0x183   :  { %v1600_v52 = vld [vmem:[#allocation2] sm:$0x1] }
 0x184   :  { %v1601_v50 = vmul.f32 0.00390625, %v1600_v52 }
 0x186   :  { %1602 = vst [vmem:[#allocation6] sm:$0x1] %v1601_v50 }
 0x187   :  { %1658 = shalt.err (!%p1655_p9)
}
 0x188   :  { %1612 = dma.vmem_to_hbm [thread:$0]  %s1610_s13, 16, %s2016_s1, [#allocation5]  }
 0x189   :  { %1669 = dma.done.wait [#allocation5], 16  }
 0x18a   :  { %1670 = vsyncadd [#allocation5], 4294967280 }
 0x18b   :  { %1616 = vsyncpa [#allocation4], 1 }
 0x18c   :  { %1617 = vsyncpa [#allocation5], 1 }

</bundles_post_ra>
